<compile_context>
chip_gen: v7x
topology: tpu7x:2x2x1
jax: 0.10.0
libtpu: 0.0.40
codegen_flags: <defaults>
</compile_context>

<pallas_src>
import functools

import jax
import jax.numpy as jnp
import numpy as np
from jax.experimental import pallas as pl
from jax.experimental.pallas import tpu as pltpu

EPS = 1e-5
NEG_SLOPE = 0.1

# 3x3 taps in the same (kh, kw) row-major order as the HWIO weight layout.
TAPS = tuple((dy, dx) for dy in (-1, 0, 1) for dx in (-1, 0, 1))


# ----------------------------------------------------------------------------
# Fused kernel: three [conv3x3(pad=1) + folded-BN + LeakyReLU] stages and the
# residual add.  Activations are lane-dense (C, HW_pad) slabs; each conv is a
# single K = 9*Cin_pad MXU dot against an im2col slab built in VMEM.
# ----------------------------------------------------------------------------
def _basic_block_kernel(masks_ref, x_ref, w1_ref, b1_ref, w2_ref, b2_ref,
                        w3_ref, b3_ref, out_ref, col_ref, *,
                        batch_tile, cin, cin_pad, W, HW_pad, pad_lanes,
                        need_tail_mask, slope, mxu_dtype):
    # --- once per grid step: zero only the scratch regions the dot-window
    # read touches but the tap stores never cover.  (a) the <=|shift| column
    # gap at one edge of each shifted row-block (this IS the conv row
    # zero-padding), (b) the cin -> cin_pad padding rows.  Tiny vs. the full
    # slab, and megacore-safe (no program_id==0 persistence assumption).
    for t, (dy, dx) in enumerate(TAPS):
        s = dy * W + dx
        r0 = t * cin_pad
        if s > 0:
            col_ref[r0:r0 + cin,
                    pad_lanes + HW_pad - s:pad_lanes + HW_pad] = (
                        jnp.zeros((cin, s), mxu_dtype))
        elif s < 0:
            col_ref[r0:r0 + cin, pad_lanes:pad_lanes - s] = (
                jnp.zeros((cin, -s), mxu_dtype))
        if cin_pad > cin:
            col_ref[r0 + cin:r0 + cin_pad,
                    pad_lanes:pad_lanes + HW_pad] = (
                        jnp.zeros((cin_pad - cin, HW_pad), mxu_dtype))

    lrelu = lambda v: jnp.where(v >= 0, v, slope * v)            # LeakyReLU(0.1)

    # Pre-masked SOURCE copies: dx=-1 taps can only ever wrap onto source
    # column W-1, dx=+1 taps only onto source column 0, so two pre-masked
    # copies replace six per-tap mask multiplies.  The dx=0 mask only zeroes
    # the HW -> HW_pad lane padding (skipped when there is none).
    m0 = masks_ref[0:1, :]
    m_m1 = masks_ref[1:2, :]
    m_p1 = masks_ref[2:3, :]

    def conv3x3_bn(act_f32, w_ref, b_ref):
        """3x3 conv (stride 1, zero pad 1) with BN folded in; one MXU dot."""
        act = act_f32.astype(mxu_dtype)
        src = {0: act * m0 if need_tail_mask else act,
               -1: act * m_m1,
               1: act * m_p1}
        # Store each copy at a column offset of -shift so that ONE
        # lane-aligned window read gives the (9*cin_pad, HW_pad) im2col slab.
        for t, (dy, dx) in enumerate(TAPS):
            start = pad_lanes - (dy * W + dx)
            col_ref[t * cin_pad:t * cin_pad + cin,
                    start:start + HW_pad] = src[dx]
        rhs = col_ref[:, pad_lanes:pad_lanes + HW_pad]           # (9*cin_pad, HW_pad)
        acc = jnp.dot(w_ref[...], rhs, preferred_element_type=jnp.float32)
        return acc + b_ref[...]                                  # folded BN bias

    for b in range(batch_tile):                                  # static unroll
        x = x_ref[b]                                             # (C, HW_pad) f32
        a = lrelu(conv3x3_bn(x, w1_ref, b1_ref))
        a = lrelu(conv3x3_bn(a, w2_ref, b2_ref))
        # Re-read the residual from the resident input block (shrinks the
        # live range vs. carrying `x` across all three stages).
        a = conv3x3_bn(a, w3_ref, b3_ref) + x_ref[b]
        out_ref[b] = lrelu(a)                                    # MaxPool2d(1) == id


# ----------------------------------------------------------------------------
# Wrapper.  Input/output are NCHW (PyTorch convention); (B,C,H,W) <->
# (B,C,H*W) reshapes are free (contiguous minor dims), no transposes.
# ----------------------------------------------------------------------------
def _fold_bn(gamma, beta, mean, var):
    scale = gamma / jnp.sqrt(var + EPS)
    return scale, beta - mean * scale


def _round_up(v, m):
    return (v + m - 1) // m * m


@functools.partial(jax.jit, static_argnames=("mxu_dtype",))
def basic_block_forward(x_nchw, params, mxu_dtype=jnp.bfloat16):
    B, C, H, W = x_nchw.shape
    HW = H * W
    HW_pad = _round_up(HW, 128)                     # lane-dense stores
    dt_bytes = jnp.dtype(mxu_dtype).itemsize
    sub = 8 * (4 // dt_bytes)                       # sublane tile (16 for bf16)
    cin_pad = _round_up(C, sub)                     # aligned tap row-blocks
    k_pad = 9 * cin_pad
    pad_lanes = _round_up(W + 1, 128)               # store-spill halo, lane aligned
    need_tail_mask = HW_pad != HW

    x_flat = x_nchw.reshape(B, C, HW).astype(jnp.float32)
    if need_tail_mask:
        x_flat = jnp.pad(x_flat, ((0, 0), (0, 0), (0, HW_pad - HW)))

    # Flat lane-dense masks, built once at trace time (no in-kernel relayout):
    idx = jnp.arange(HW_pad, dtype=jnp.int32)
    col = idx % W
    valid = idx < HW
    masks = jnp.stack([valid,                        # dx = 0  (lane padding only)
                       valid & (col < (W - 1)),      # dx = -1 (source col W-1 zeroed)
                       valid & (col >= 1)],          # dx = +1 (source col 0 zeroed)
                      ).astype(mxu_dtype)            # (3, HW_pad)

    def folded(idx_):
        w = params[f"w{idx_}"]                       # HWIO (3, 3, Cin, Cout)
        cin, cout = w.shape[2], w.shape[3]
        assert cin == C and cout == C, "BasicBlock w/o downsample needs Cin==Cout"
        scale, bias = _fold_bn(params[f"g{idx_}"], params[f"be{idx_}"],
                               params[f"m{idx_}"], params[f"v{idx_}"])
        # (3,3,Cin,Cout) -> (Cout, 9, Cin) with BN scale folded, Cin padded to
        # cin_pad (padded columns meet zeroed scratch rows), -> (Cout, 9*cin_pad).
        wt = (jnp.transpose(w, (3, 0, 1, 2)).reshape(cout, 9, cin)
              * scale[:, None, None])
        wt = jnp.pad(wt, ((0, 0), (0, 0), (0, cin_pad - cin)))
        return (wt.reshape(cout, k_pad).astype(mxu_dtype),
                bias.reshape(cout, 1).astype(jnp.float32))

    w1, b1 = folded(1)
    w2, b2 = folded(2)
    w3, b3 = folded(3)

    # Fold batch into the block (fewer serial grid steps on single-TC v5e/v6e)
    # while keeping >= 2 parallel steps so both v7x TensorCores stay busy.
    batch_tile = 1
    for d in range(B, 0, -1):
        if B % d == 0 and (B // d >= 2 or B == 1):
            batch_tile = d
            break
    steps = B // batch_tile

    kernel = functools.partial(
        _basic_block_kernel, batch_tile=batch_tile, cin=C, cin_pad=cin_pad,
        W=W, HW_pad=HW_pad, pad_lanes=pad_lanes,
        need_tail_mask=need_tail_mask, slope=NEG_SLOPE, mxu_dtype=mxu_dtype)

    def const_spec(shape):
        return pl.BlockSpec(shape, lambda s, _shape=shape: (0,) * len(_shape))

    batch_spec = pl.BlockSpec((batch_tile, C, HW_pad), lambda s: (s, 0, 0))

    scratch_bytes = k_pad * (HW_pad + 2 * pad_lanes) * dt_bytes
    block_bytes = batch_tile * C * HW_pad * 4
    const_bytes = 3 * (C * k_pad * dt_bytes + C * 4) + 3 * HW_pad * dt_bytes
    vmem_limit = int(min(64 * 2 ** 20,
                         max(16 * 2 ** 20,
                             2 * (scratch_bytes + 4 * block_bytes + const_bytes))))

    out_flat = pl.pallas_call(
        kernel,
        out_shape=jax.ShapeDtypeStruct((B, C, HW_pad), jnp.float32),
        grid=(steps,),
        in_specs=[const_spec((3, HW_pad)),
                  batch_spec,
                  const_spec((C, k_pad)), const_spec((C, 1)),
                  const_spec((C, k_pad)), const_spec((C, 1)),
                  const_spec((C, k_pad)), const_spec((C, 1))],
        out_specs=batch_spec,
        scratch_shapes=[pltpu.VMEM((k_pad, HW_pad + 2 * pad_lanes), mxu_dtype)],
        compiler_params=pltpu.CompilerParams(
            dimension_semantics=("parallel",),
            vmem_limit_bytes=vmem_limit),
    )(masks, x_flat, w1, b1, w2, b2, w3, b3)

    out = out_flat[:, :, :HW] if need_tail_mask else out_flat
    return out.reshape(B, C, H, W)


# ----------------------------------------------------------------------------
# Pure-JAX reference (NCHW / OIHW, f32 throughout) for the correctness check.
# ----------------------------------------------------------------------------
def ref_forward(x, params):
    def conv(x, w_hwio):
        w_oihw = jnp.transpose(w_hwio, (3, 2, 0, 1))
        return jax.lax.conv_general_dilated(
            x, w_oihw, (1, 1), ((1, 1), (1, 1)),
            dimension_numbers=("NCHW", "OIHW", "NCHW"))

    def bn(x, g, b, m, v):
        return (x - m[None, :, None, None]) / jnp.sqrt(v[None, :, None, None] + EPS) \
            * g[None, :, None, None] + b[None, :, None, None]

    lrelu = lambda t: jnp.where(t >= 0, t, NEG_SLOPE * t)

    out = lrelu(bn(conv(x, params["w1"]), params["g1"], params["be1"],
                   params["m1"], params["v1"]))
    out = lrelu(bn(conv(out, params["w2"]), params["g2"], params["be2"],
                   params["m2"], params["v2"]))
    out = bn(conv(out, params["w3"]), params["g3"], params["be3"],
             params["m3"], params["v3"]) + x
    out = lrelu(out)
    return out


# ----------------------------------------------------------------------------
if __name__ == "__main__":
    B, C, Hs, Ws = 2, 4, 16, 16          # inplanes = planes = 4 (downsample=None)
    key = jax.random.PRNGKey(0)
    ks = jax.random.split(key, 16)

    x = jax.random.normal(ks[0], (B, C, Hs, Ws), jnp.float32)

    def conv_w(k):  # HWIO
        return 0.1 * jax.random.normal(k, (3, 3, C, C), jnp.float32)

    params = {
        "w1": conv_w(ks[1]), "w2": conv_w(ks[2]), "w3": conv_w(ks[3]),
        "g1": 1.0 + 0.1 * jax.random.normal(ks[4], (C,), jnp.float32),
        "be1": 0.1 * jax.random.normal(ks[5], (C,), jnp.float32),
        "m1": 0.1 * jax.random.normal(ks[6], (C,), jnp.float32),
        "v1": jax.random.uniform(ks[7], (C,), jnp.float32, 0.5, 1.5),
        "g2": 1.0 + 0.1 * jax.random.normal(ks[8], (C,), jnp.float32),
        "be2": 0.1 * jax.random.normal(ks[9], (C,), jnp.float32),
        "m2": 0.1 * jax.random.normal(ks[10], (C,), jnp.float32),
        "v2": jax.random.uniform(ks[11], (C,), jnp.float32, 0.5, 1.5),
        "g3": 1.0 + 0.1 * jax.random.normal(ks[12], (C,), jnp.float32),
        "be3": 0.1 * jax.random.normal(ks[13], (C,), jnp.float32),
        "m3": 0.1 * jax.random.normal(ks[14], (C,), jnp.float32),
        "v3": jax.random.uniform(ks[15], (C,), jnp.float32, 0.5, 1.5),
    }

    out = jax.block_until_ready(basic_block_forward(x, params))
    ref = jax.block_until_ready(ref_forward(x, params))

    # bf16 MXU operands (f32 accumulate / epilogue): tolerance covers the
    # bf16 operand-quantization error over the three chained conv stages.
    np.testing.assert_allclose(np.asarray(out), np.asarray(ref),
                               rtol=2e-2, atol=2e-2)
    assert out.shape == (B, C, Hs, Ws) and out.dtype == jnp.float32

    print("KERNEL_OK")
</pallas_src>

<mosaic_0001>
module attributes {stable_mosaic.version = 11 : i64} {
  func.func @_basic_block_kernel(%arg0: i32, %arg1: memref<3x256xbf16, #tpu.memory_space<vmem>>, %arg2: memref<1x4x256xf32, #tpu.memory_space<vmem>>, %arg3: memref<4x144xbf16, #tpu.memory_space<vmem>>, %arg4: memref<4x1xf32, #tpu.memory_space<vmem>>, %arg5: memref<4x144xbf16, #tpu.memory_space<vmem>>, %arg6: memref<4x1xf32, #tpu.memory_space<vmem>>, %arg7: memref<4x144xbf16, #tpu.memory_space<vmem>>, %arg8: memref<4x1xf32, #tpu.memory_space<vmem>>, %arg9: memref<1x4x256xf32, #tpu.memory_space<vmem>>, %arg10: memref<144x512xbf16, #tpu.memory_space<vmem>>) attributes {dimension_semantics = [#tpu.dimension_semantics<parallel>], iteration_bounds = array<i64: 2>, scalar_prefetch = 0 : i64, scratch_operands = 1 : i64, tpu.core_type = #tpu.core_type<tc>, window_params = [{pipeline_mode = #tpu.pipeline_mode<synchronous>, transform_indices = @transform_0, window_bounds = array<i64: 3, 256>}, {transform_indices = @transform_1, window_bounds = array<i64: 1, 4, 256>}, {pipeline_mode = #tpu.pipeline_mode<synchronous>, transform_indices = @transform_2, window_bounds = array<i64: 4, 144>}, {pipeline_mode = #tpu.pipeline_mode<synchronous>, transform_indices = @transform_3, window_bounds = array<i64: 4, 1>}, {pipeline_mode = #tpu.pipeline_mode<synchronous>, transform_indices = @transform_4, window_bounds = array<i64: 4, 144>}, {pipeline_mode = #tpu.pipeline_mode<synchronous>, transform_indices = @transform_5, window_bounds = array<i64: 4, 1>}, {pipeline_mode = #tpu.pipeline_mode<synchronous>, transform_indices = @transform_6, window_bounds = array<i64: 4, 144>}, {pipeline_mode = #tpu.pipeline_mode<synchronous>, transform_indices = @transform_7, window_bounds = array<i64: 4, 1>}, {transform_indices = @transform_8, window_bounds = array<i64: 1, 4, 256>}]} {
    %cst = arith.constant 0.000000e+00 : bf16
    %0 = vector.broadcast %cst : bf16 to vector<4x17xbf16>
    %c0 = arith.constant 0 : index
    %c128 = arith.constant 128 : index
    %1 = vector.load %arg10[%c0, %c128] : memref<144x512xbf16, #tpu.memory_space<vmem>>, vector<4x17xbf16>
    tpu.vector_store %arg10[%c0, %c128], %0 {strides = array<i32>} : memref<144x512xbf16, #tpu.memory_space<vmem>>, vector<4x17xbf16>,
    %cst_0 = arith.constant 0.000000e+00 : bf16
    %2 = vector.broadcast %cst_0 : bf16 to vector<12x256xbf16>
    %c4 = arith.constant 4 : index
    %c128_1 = arith.constant 128 : index
    %3 = vector.load %arg10[%c4, %c128_1] : memref<144x512xbf16, #tpu.memory_space<vmem>>, vector<12x256xbf16>
    tpu.vector_store %arg10[%c4, %c128_1], %2 {strides = array<i32>} : memref<144x512xbf16, #tpu.memory_space<vmem>>, vector<12x256xbf16>,
    %cst_2 = arith.constant 0.000000e+00 : bf16
    %4 = vector.broadcast %cst_2 : bf16 to vector<4x16xbf16>
    %c16 = arith.constant 16 : index
    %c128_3 = arith.constant 128 : index
    %5 = vector.load %arg10[%c16, %c128_3] : memref<144x512xbf16, #tpu.memory_space<vmem>>, vector<4x16xbf16>
    tpu.vector_store %arg10[%c16, %c128_3], %4 {strides = array<i32>} : memref<144x512xbf16, #tpu.memory_space<vmem>>, vector<4x16xbf16>,
    %cst_4 = arith.constant 0.000000e+00 : bf16
    %6 = vector.broadcast %cst_4 : bf16 to vector<12x256xbf16>
    %c20 = arith.constant 20 : index
    %c128_5 = arith.constant 128 : index
    %7 = vector.load %arg10[%c20, %c128_5] : memref<144x512xbf16, #tpu.memory_space<vmem>>, vector<12x256xbf16>
    tpu.vector_store %arg10[%c20, %c128_5], %6 {strides = array<i32>} : memref<144x512xbf16, #tpu.memory_space<vmem>>, vector<12x256xbf16>,
    %cst_6 = arith.constant 0.000000e+00 : bf16
    %8 = vector.broadcast %cst_6 : bf16 to vector<4x15xbf16>
    %c32 = arith.constant 32 : index
    %c128_7 = arith.constant 128 : index
    %9 = vector.load %arg10[%c32, %c128_7] : memref<144x512xbf16, #tpu.memory_space<vmem>>, vector<4x15xbf16>
    tpu.vector_store %arg10[%c32, %c128_7], %8 {strides = array<i32>} : memref<144x512xbf16, #tpu.memory_space<vmem>>, vector<4x15xbf16>,
    %cst_8 = arith.constant 0.000000e+00 : bf16
    %10 = vector.broadcast %cst_8 : bf16 to vector<12x256xbf16>
    %c36 = arith.constant 36 : index
    %c128_9 = arith.constant 128 : index
    %11 = vector.load %arg10[%c36, %c128_9] : memref<144x512xbf16, #tpu.memory_space<vmem>>, vector<12x256xbf16>
    tpu.vector_store %arg10[%c36, %c128_9], %10 {strides = array<i32>} : memref<144x512xbf16, #tpu.memory_space<vmem>>, vector<12x256xbf16>,
    %cst_10 = arith.constant 0.000000e+00 : bf16
    %12 = vector.broadcast %cst_10 : bf16 to vector<4x1xbf16>
    %c48 = arith.constant 48 : index
    %c128_11 = arith.constant 128 : index
    %13 = vector.load %arg10[%c48, %c128_11] : memref<144x512xbf16, #tpu.memory_space<vmem>>, vector<4x1xbf16>
    tpu.vector_store %arg10[%c48, %c128_11], %12 {strides = array<i32>} : memref<144x512xbf16, #tpu.memory_space<vmem>>, vector<4x1xbf16>,
    %cst_12 = arith.constant 0.000000e+00 : bf16
    %14 = vector.broadcast %cst_12 : bf16 to vector<12x256xbf16>
    %c52 = arith.constant 52 : index
    %c128_13 = arith.constant 128 : index
    %15 = vector.load %arg10[%c52, %c128_13] : memref<144x512xbf16, #tpu.memory_space<vmem>>, vector<12x256xbf16>
    tpu.vector_store %arg10[%c52, %c128_13], %14 {strides = array<i32>} : memref<144x512xbf16, #tpu.memory_space<vmem>>, vector<12x256xbf16>,
    %cst_14 = arith.constant 0.000000e+00 : bf16
    %16 = vector.broadcast %cst_14 : bf16 to vector<12x256xbf16>
    %c68 = arith.constant 68 : index
    %c128_15 = arith.constant 128 : index
    %17 = vector.load %arg10[%c68, %c128_15] : memref<144x512xbf16, #tpu.memory_space<vmem>>, vector<12x256xbf16>
    tpu.vector_store %arg10[%c68, %c128_15], %16 {strides = array<i32>} : memref<144x512xbf16, #tpu.memory_space<vmem>>, vector<12x256xbf16>,
    %cst_16 = arith.constant 0.000000e+00 : bf16
    %18 = vector.broadcast %cst_16 : bf16 to vector<4x1xbf16>
    %c80 = arith.constant 80 : index
    %c383 = arith.constant 383 : index
    %19 = vector.load %arg10[%c80, %c383] : memref<144x512xbf16, #tpu.memory_space<vmem>>, vector<4x1xbf16>
    tpu.vector_store %arg10[%c80, %c383], %18 {strides = array<i32>} : memref<144x512xbf16, #tpu.memory_space<vmem>>, vector<4x1xbf16>,
    %cst_17 = arith.constant 0.000000e+00 : bf16
    %20 = vector.broadcast %cst_17 : bf16 to vector<12x256xbf16>
    %c84 = arith.constant 84 : index
    %c128_18 = arith.constant 128 : index
    %21 = vector.load %arg10[%c84, %c128_18] : memref<144x512xbf16, #tpu.memory_space<vmem>>, vector<12x256xbf16>
    tpu.vector_store %arg10[%c84, %c128_18], %20 {strides = array<i32>} : memref<144x512xbf16, #tpu.memory_space<vmem>>, vector<12x256xbf16>,
    %cst_19 = arith.constant 0.000000e+00 : bf16
    %22 = vector.broadcast %cst_19 : bf16 to vector<4x15xbf16>
    %c96 = arith.constant 96 : index
    %c369 = arith.constant 369 : index
    %23 = vector.load %arg10[%c96, %c369] : memref<144x512xbf16, #tpu.memory_space<vmem>>, vector<4x15xbf16>
    tpu.vector_store %arg10[%c96, %c369], %22 {strides = array<i32>} : memref<144x512xbf16, #tpu.memory_space<vmem>>, vector<4x15xbf16>,
    %cst_20 = arith.constant 0.000000e+00 : bf16
    %24 = vector.broadcast %cst_20 : bf16 to vector<12x256xbf16>
    %c100 = arith.constant 100 : index
    %c128_21 = arith.constant 128 : index
    %25 = vector.load %arg10[%c100, %c128_21] : memref<144x512xbf16, #tpu.memory_space<vmem>>, vector<12x256xbf16>
    tpu.vector_store %arg10[%c100, %c128_21], %24 {strides = array<i32>} : memref<144x512xbf16, #tpu.memory_space<vmem>>, vector<12x256xbf16>,
    %cst_22 = arith.constant 0.000000e+00 : bf16
    %26 = vector.broadcast %cst_22 : bf16 to vector<4x16xbf16>
    %c112 = arith.constant 112 : index
    %c368 = arith.constant 368 : index
    %27 = vector.load %arg10[%c112, %c368] : memref<144x512xbf16, #tpu.memory_space<vmem>>, vector<4x16xbf16>
    tpu.vector_store %arg10[%c112, %c368], %26 {strides = array<i32>} : memref<144x512xbf16, #tpu.memory_space<vmem>>, vector<4x16xbf16>,
    %cst_23 = arith.constant 0.000000e+00 : bf16
    %28 = vector.broadcast %cst_23 : bf16 to vector<12x256xbf16>
    %c116 = arith.constant 116 : index
    %c128_24 = arith.constant 128 : index
    %29 = vector.load %arg10[%c116, %c128_24] : memref<144x512xbf16, #tpu.memory_space<vmem>>, vector<12x256xbf16>
    tpu.vector_store %arg10[%c116, %c128_24], %28 {strides = array<i32>} : memref<144x512xbf16, #tpu.memory_space<vmem>>, vector<12x256xbf16>,
    %cst_25 = arith.constant 0.000000e+00 : bf16
    %30 = vector.broadcast %cst_25 : bf16 to vector<4x17xbf16>
    %c128_26 = arith.constant 128 : index
    %c367 = arith.constant 367 : index
    %31 = vector.load %arg10[%c128_26, %c367] : memref<144x512xbf16, #tpu.memory_space<vmem>>, vector<4x17xbf16>
    tpu.vector_store %arg10[%c128_26, %c367], %30 {strides = array<i32>} : memref<144x512xbf16, #tpu.memory_space<vmem>>, vector<4x17xbf16>,
    %cst_27 = arith.constant 0.000000e+00 : bf16
    %32 = vector.broadcast %cst_27 : bf16 to vector<12x256xbf16>
    %c132 = arith.constant 132 : index
    %c128_28 = arith.constant 128 : index
    %33 = vector.load %arg10[%c132, %c128_28] : memref<144x512xbf16, #tpu.memory_space<vmem>>, vector<12x256xbf16>
    tpu.vector_store %arg10[%c132, %c128_28], %32 {strides = array<i32>} : memref<144x512xbf16, #tpu.memory_space<vmem>>, vector<12x256xbf16>,
    %c1 = arith.constant 1 : index
    %c0_29 = arith.constant 0 : index
    %34 = vector.load %arg1[%c1, %c0_29] : memref<3x256xbf16, #tpu.memory_space<vmem>>, vector<1x256xbf16>
    %c2 = arith.constant 2 : index
    %c0_30 = arith.constant 0 : index
    %35 = vector.load %arg1[%c2, %c0_30] : memref<3x256xbf16, #tpu.memory_space<vmem>>, vector<1x256xbf16>
    %c0_31 = arith.constant 0 : index
    %c0_32 = arith.constant 0 : index
    %c0_33 = arith.constant 0 : index
    %36 = vector.load %arg2[%c0_31, %c0_32, %c0_33] : memref<1x4x256xf32, #tpu.memory_space<vmem>>, vector<1x4x256xf32>
    %37 = vector.shape_cast %36 : vector<1x4x256xf32> to vector<4x256xf32>
    %38 = arith.truncf %37 : vector<4x256xf32> to vector<4x256xbf16>
    %39 = vector.broadcast %34 : vector<1x256xbf16> to vector<4x256xbf16>
    %40 = arith.mulf %38, %39 : vector<4x256xbf16>
    %41 = vector.broadcast %35 : vector<1x256xbf16> to vector<4x256xbf16>
    %42 = arith.mulf %38, %41 : vector<4x256xbf16>
    %c0_34 = arith.constant 0 : index
    %c145 = arith.constant 145 : index
    %43 = vector.load %arg10[%c0_34, %c145] : memref<144x512xbf16, #tpu.memory_space<vmem>>, vector<4x256xbf16>
    tpu.vector_store %arg10[%c0_34, %c145], %40 {strides = array<i32>} : memref<144x512xbf16, #tpu.memory_space<vmem>>, vector<4x256xbf16>,
    %c16_35 = arith.constant 16 : index
    %c144 = arith.constant 144 : index
    %44 = vector.load %arg10[%c16_35, %c144] : memref<144x512xbf16, #tpu.memory_space<vmem>>, vector<4x256xbf16>
    tpu.vector_store %arg10[%c16_35, %c144], %38 {strides = array<i32>} : memref<144x512xbf16, #tpu.memory_space<vmem>>, vector<4x256xbf16>,
    %c32_36 = arith.constant 32 : index
    %c143 = arith.constant 143 : index
    %45 = vector.load %arg10[%c32_36, %c143] : memref<144x512xbf16, #tpu.memory_space<vmem>>, vector<4x256xbf16>
    tpu.vector_store %arg10[%c32_36, %c143], %42 {strides = array<i32>} : memref<144x512xbf16, #tpu.memory_space<vmem>>, vector<4x256xbf16>,
    %c48_37 = arith.constant 48 : index
    %c129 = arith.constant 129 : index
    %46 = vector.load %arg10[%c48_37, %c129] : memref<144x512xbf16, #tpu.memory_space<vmem>>, vector<4x256xbf16>
    tpu.vector_store %arg10[%c48_37, %c129], %40 {strides = array<i32>} : memref<144x512xbf16, #tpu.memory_space<vmem>>, vector<4x256xbf16>,
    %c64 = arith.constant 64 : index
    %c128_38 = arith.constant 128 : index
    %47 = vector.load %arg10[%c64, %c128_38] : memref<144x512xbf16, #tpu.memory_space<vmem>>, vector<4x256xbf16>
    tpu.vector_store %arg10[%c64, %c128_38], %38 {strides = array<i32>} : memref<144x512xbf16, #tpu.memory_space<vmem>>, vector<4x256xbf16>,
    %c80_39 = arith.constant 80 : index
    %c127 = arith.constant 127 : index
    %48 = vector.load %arg10[%c80_39, %c127] : memref<144x512xbf16, #tpu.memory_space<vmem>>, vector<4x256xbf16>
    tpu.vector_store %arg10[%c80_39, %c127], %42 {strides = array<i32>} : memref<144x512xbf16, #tpu.memory_space<vmem>>, vector<4x256xbf16>,
    %c96_40 = arith.constant 96 : index
    %c113 = arith.constant 113 : index
    %49 = vector.load %arg10[%c96_40, %c113] : memref<144x512xbf16, #tpu.memory_space<vmem>>, vector<4x256xbf16>
    tpu.vector_store %arg10[%c96_40, %c113], %40 {strides = array<i32>} : memref<144x512xbf16, #tpu.memory_space<vmem>>, vector<4x256xbf16>,
    %c112_41 = arith.constant 112 : index
    %c112_42 = arith.constant 112 : index
    %50 = vector.load %arg10[%c112_41, %c112_42] : memref<144x512xbf16, #tpu.memory_space<vmem>>, vector<4x256xbf16>
    tpu.vector_store %arg10[%c112_41, %c112_42], %38 {strides = array<i32>} : memref<144x512xbf16, #tpu.memory_space<vmem>>, vector<4x256xbf16>,
    %c128_43 = arith.constant 128 : index
    %c111 = arith.constant 111 : index
    %51 = vector.load %arg10[%c128_43, %c111] : memref<144x512xbf16, #tpu.memory_space<vmem>>, vector<4x256xbf16>
    tpu.vector_store %arg10[%c128_43, %c111], %42 {strides = array<i32>} : memref<144x512xbf16, #tpu.memory_space<vmem>>, vector<4x256xbf16>,
    %c0_44 = arith.constant 0 : index
    %c128_45 = arith.constant 128 : index
    %52 = vector.load %arg10[%c0_44, %c128_45] : memref<144x512xbf16, #tpu.memory_space<vmem>>, vector<144x256xbf16>
    %c0_46 = arith.constant 0 : index
    %c0_47 = arith.constant 0 : index
    %53 = vector.load %arg3[%c0_46, %c0_47] : memref<4x144xbf16, #tpu.memory_space<vmem>>, vector<4x144xbf16>
    %cst_48 = arith.constant dense<0.000000e+00> : vector<4x256xf32>
    %54 = tpu.matmul %53, %52, %cst_48 {dimension_numbers = #tpu.dot_dimension_numbers<[1], [0], [0], [1], [0, 0, 1, 1], [], []>} : vector<4x144xbf16>, vector<144x256xbf16>, vector<4x256xf32> -> vector<4x256xf32>
    %c0_49 = arith.constant 0 : index
    %c0_50 = arith.constant 0 : index
    %55 = vector.load %arg4[%c0_49, %c0_50] : memref<4x1xf32, #tpu.memory_space<vmem>>, vector<4x1xf32>
    %56 = vector.broadcast %55 : vector<4x1xf32> to vector<4x256xf32>
    %57 = arith.addf %54, %56 : vector<4x256xf32>
    %cst_51 = arith.constant 0.000000e+00 : f32
    %58 = vector.broadcast %cst_51 : f32 to vector<4x256xf32>
    %59 = arith.cmpf oge, %57, %58 : vector<4x256xf32>
    %cst_52 = arith.constant 1.000000e-01 : f32
    %60 = vector.broadcast %cst_52 : f32 to vector<4x256xf32>
    %61 = arith.mulf %60, %57 : vector<4x256xf32>
    %62 = arith.select %59, %57, %61 : vector<4x256xi1>, vector<4x256xf32>
    %63 = arith.truncf %62 : vector<4x256xf32> to vector<4x256xbf16>
    %64 = vector.broadcast %34 : vector<1x256xbf16> to vector<4x256xbf16>
    %65 = arith.mulf %63, %64 : vector<4x256xbf16>
    %66 = vector.broadcast %35 : vector<1x256xbf16> to vector<4x256xbf16>
    %67 = arith.mulf %63, %66 : vector<4x256xbf16>
    %c0_53 = arith.constant 0 : index
    %c145_54 = arith.constant 145 : index
    %68 = vector.load %arg10[%c0_53, %c145_54] : memref<144x512xbf16, #tpu.memory_space<vmem>>, vector<4x256xbf16>
    tpu.vector_store %arg10[%c0_53, %c145_54], %65 {strides = array<i32>} : memref<144x512xbf16, #tpu.memory_space<vmem>>, vector<4x256xbf16>,
    %c16_55 = arith.constant 16 : index
    %c144_56 = arith.constant 144 : index
    %69 = vector.load %arg10[%c16_55, %c144_56] : memref<144x512xbf16, #tpu.memory_space<vmem>>, vector<4x256xbf16>
    tpu.vector_store %arg10[%c16_55, %c144_56], %63 {strides = array<i32>} : memref<144x512xbf16, #tpu.memory_space<vmem>>, vector<4x256xbf16>,
    %c32_57 = arith.constant 32 : index
    %c143_58 = arith.constant 143 : index
    %70 = vector.load %arg10[%c32_57, %c143_58] : memref<144x512xbf16, #tpu.memory_space<vmem>>, vector<4x256xbf16>
    tpu.vector_store %arg10[%c32_57, %c143_58], %67 {strides = array<i32>} : memref<144x512xbf16, #tpu.memory_space<vmem>>, vector<4x256xbf16>,
    %c48_59 = arith.constant 48 : index
    %c129_60 = arith.constant 129 : index
    %71 = vector.load %arg10[%c48_59, %c129_60] : memref<144x512xbf16, #tpu.memory_space<vmem>>, vector<4x256xbf16>
    tpu.vector_store %arg10[%c48_59, %c129_60], %65 {strides = array<i32>} : memref<144x512xbf16, #tpu.memory_space<vmem>>, vector<4x256xbf16>,
    %c64_61 = arith.constant 64 : index
    %c128_62 = arith.constant 128 : index
    %72 = vector.load %arg10[%c64_61, %c128_62] : memref<144x512xbf16, #tpu.memory_space<vmem>>, vector<4x256xbf16>
    tpu.vector_store %arg10[%c64_61, %c128_62], %63 {strides = array<i32>} : memref<144x512xbf16, #tpu.memory_space<vmem>>, vector<4x256xbf16>,
    %c80_63 = arith.constant 80 : index
    %c127_64 = arith.constant 127 : index
    %73 = vector.load %arg10[%c80_63, %c127_64] : memref<144x512xbf16, #tpu.memory_space<vmem>>, vector<4x256xbf16>
    tpu.vector_store %arg10[%c80_63, %c127_64], %67 {strides = array<i32>} : memref<144x512xbf16, #tpu.memory_space<vmem>>, vector<4x256xbf16>,
    %c96_65 = arith.constant 96 : index
    %c113_66 = arith.constant 113 : index
    %74 = vector.load %arg10[%c96_65, %c113_66] : memref<144x512xbf16, #tpu.memory_space<vmem>>, vector<4x256xbf16>
    tpu.vector_store %arg10[%c96_65, %c113_66], %65 {strides = array<i32>} : memref<144x512xbf16, #tpu.memory_space<vmem>>, vector<4x256xbf16>,
    %c112_67 = arith.constant 112 : index
    %c112_68 = arith.constant 112 : index
    %75 = vector.load %arg10[%c112_67, %c112_68] : memref<144x512xbf16, #tpu.memory_space<vmem>>, vector<4x256xbf16>
    tpu.vector_store %arg10[%c112_67, %c112_68], %63 {strides = array<i32>} : memref<144x512xbf16, #tpu.memory_space<vmem>>, vector<4x256xbf16>,
    %c128_69 = arith.constant 128 : index
    %c111_70 = arith.constant 111 : index
    %76 = vector.load %arg10[%c128_69, %c111_70] : memref<144x512xbf16, #tpu.memory_space<vmem>>, vector<4x256xbf16>
    tpu.vector_store %arg10[%c128_69, %c111_70], %67 {strides = array<i32>} : memref<144x512xbf16, #tpu.memory_space<vmem>>, vector<4x256xbf16>,
    %c0_71 = arith.constant 0 : index
    %c128_72 = arith.constant 128 : index
    %77 = vector.load %arg10[%c0_71, %c128_72] : memref<144x512xbf16, #tpu.memory_space<vmem>>, vector<144x256xbf16>
    %c0_73 = arith.constant 0 : index
    %c0_74 = arith.constant 0 : index
    %78 = vector.load %arg5[%c0_73, %c0_74] : memref<4x144xbf16, #tpu.memory_space<vmem>>, vector<4x144xbf16>
    %cst_75 = arith.constant dense<0.000000e+00> : vector<4x256xf32>
    %79 = tpu.matmul %78, %77, %cst_75 {dimension_numbers = #tpu.dot_dimension_numbers<[1], [0], [0], [1], [0, 0, 1, 1], [], []>} : vector<4x144xbf16>, vector<144x256xbf16>, vector<4x256xf32> -> vector<4x256xf32>
    %c0_76 = arith.constant 0 : index
    %c0_77 = arith.constant 0 : index
    %80 = vector.load %arg6[%c0_76, %c0_77] : memref<4x1xf32, #tpu.memory_space<vmem>>, vector<4x1xf32>
    %81 = vector.broadcast %80 : vector<4x1xf32> to vector<4x256xf32>
    %82 = arith.addf %79, %81 : vector<4x256xf32>
    %cst_78 = arith.constant 0.000000e+00 : f32
    %83 = vector.broadcast %cst_78 : f32 to vector<4x256xf32>
    %84 = arith.cmpf oge, %82, %83 : vector<4x256xf32>
    %cst_79 = arith.constant 1.000000e-01 : f32
    %85 = vector.broadcast %cst_79 : f32 to vector<4x256xf32>
    %86 = arith.mulf %85, %82 : vector<4x256xf32>
    %87 = arith.select %84, %82, %86 : vector<4x256xi1>, vector<4x256xf32>
    %88 = arith.truncf %87 : vector<4x256xf32> to vector<4x256xbf16>
    %89 = vector.broadcast %34 : vector<1x256xbf16> to vector<4x256xbf16>
    %90 = arith.mulf %88, %89 : vector<4x256xbf16>
    %91 = vector.broadcast %35 : vector<1x256xbf16> to vector<4x256xbf16>
    %92 = arith.mulf %88, %91 : vector<4x256xbf16>
    %c0_80 = arith.constant 0 : index
    %c145_81 = arith.constant 145 : index
    %93 = vector.load %arg10[%c0_80, %c145_81] : memref<144x512xbf16, #tpu.memory_space<vmem>>, vector<4x256xbf16>
    tpu.vector_store %arg10[%c0_80, %c145_81], %90 {strides = array<i32>} : memref<144x512xbf16, #tpu.memory_space<vmem>>, vector<4x256xbf16>,
    %c16_82 = arith.constant 16 : index
    %c144_83 = arith.constant 144 : index
    %94 = vector.load %arg10[%c16_82, %c144_83] : memref<144x512xbf16, #tpu.memory_space<vmem>>, vector<4x256xbf16>
    tpu.vector_store %arg10[%c16_82, %c144_83], %88 {strides = array<i32>} : memref<144x512xbf16, #tpu.memory_space<vmem>>, vector<4x256xbf16>,
    %c32_84 = arith.constant 32 : index
    %c143_85 = arith.constant 143 : index
    %95 = vector.load %arg10[%c32_84, %c143_85] : memref<144x512xbf16, #tpu.memory_space<vmem>>, vector<4x256xbf16>
    tpu.vector_store %arg10[%c32_84, %c143_85], %92 {strides = array<i32>} : memref<144x512xbf16, #tpu.memory_space<vmem>>, vector<4x256xbf16>,
    %c48_86 = arith.constant 48 : index
    %c129_87 = arith.constant 129 : index
    %96 = vector.load %arg10[%c48_86, %c129_87] : memref<144x512xbf16, #tpu.memory_space<vmem>>, vector<4x256xbf16>
    tpu.vector_store %arg10[%c48_86, %c129_87], %90 {strides = array<i32>} : memref<144x512xbf16, #tpu.memory_space<vmem>>, vector<4x256xbf16>,
    %c64_88 = arith.constant 64 : index
    %c128_89 = arith.constant 128 : index
    %97 = vector.load %arg10[%c64_88, %c128_89] : memref<144x512xbf16, #tpu.memory_space<vmem>>, vector<4x256xbf16>
    tpu.vector_store %arg10[%c64_88, %c128_89], %88 {strides = array<i32>} : memref<144x512xbf16, #tpu.memory_space<vmem>>, vector<4x256xbf16>,
    %c80_90 = arith.constant 80 : index
    %c127_91 = arith.constant 127 : index
    %98 = vector.load %arg10[%c80_90, %c127_91] : memref<144x512xbf16, #tpu.memory_space<vmem>>, vector<4x256xbf16>
    tpu.vector_store %arg10[%c80_90, %c127_91], %92 {strides = array<i32>} : memref<144x512xbf16, #tpu.memory_space<vmem>>, vector<4x256xbf16>,
    %c96_92 = arith.constant 96 : index
    %c113_93 = arith.constant 113 : index
    %99 = vector.load %arg10[%c96_92, %c113_93] : memref<144x512xbf16, #tpu.memory_space<vmem>>, vector<4x256xbf16>
    tpu.vector_store %arg10[%c96_92, %c113_93], %90 {strides = array<i32>} : memref<144x512xbf16, #tpu.memory_space<vmem>>, vector<4x256xbf16>,
    %c112_94 = arith.constant 112 : index
    %c112_95 = arith.constant 112 : index
    %100 = vector.load %arg10[%c112_94, %c112_95] : memref<144x512xbf16, #tpu.memory_space<vmem>>, vector<4x256xbf16>
    tpu.vector_store %arg10[%c112_94, %c112_95], %88 {strides = array<i32>} : memref<144x512xbf16, #tpu.memory_space<vmem>>, vector<4x256xbf16>,
    %c128_96 = arith.constant 128 : index
    %c111_97 = arith.constant 111 : index
    %101 = vector.load %arg10[%c128_96, %c111_97] : memref<144x512xbf16, #tpu.memory_space<vmem>>, vector<4x256xbf16>
    tpu.vector_store %arg10[%c128_96, %c111_97], %92 {strides = array<i32>} : memref<144x512xbf16, #tpu.memory_space<vmem>>, vector<4x256xbf16>,
    %c0_98 = arith.constant 0 : index
    %c128_99 = arith.constant 128 : index
    %102 = vector.load %arg10[%c0_98, %c128_99] : memref<144x512xbf16, #tpu.memory_space<vmem>>, vector<144x256xbf16>
    %c0_100 = arith.constant 0 : index
    %c0_101 = arith.constant 0 : index
    %103 = vector.load %arg7[%c0_100, %c0_101] : memref<4x144xbf16, #tpu.memory_space<vmem>>, vector<4x144xbf16>
    %cst_102 = arith.constant dense<0.000000e+00> : vector<4x256xf32>
    %104 = tpu.matmul %103, %102, %cst_102 {dimension_numbers = #tpu.dot_dimension_numbers<[1], [0], [0], [1], [0, 0, 1, 1], [], []>} : vector<4x144xbf16>, vector<144x256xbf16>, vector<4x256xf32> -> vector<4x256xf32>
    %c0_103 = arith.constant 0 : index
    %c0_104 = arith.constant 0 : index
    %105 = vector.load %arg8[%c0_103, %c0_104] : memref<4x1xf32, #tpu.memory_space<vmem>>, vector<4x1xf32>
    %106 = vector.broadcast %105 : vector<4x1xf32> to vector<4x256xf32>
    %107 = arith.addf %104, %106 : vector<4x256xf32>
    %c0_105 = arith.constant 0 : index
    %c0_106 = arith.constant 0 : index
    %c0_107 = arith.constant 0 : index
    %108 = vector.load %arg2[%c0_105, %c0_106, %c0_107] : memref<1x4x256xf32, #tpu.memory_space<vmem>>, vector<1x4x256xf32>
    %109 = vector.shape_cast %108 : vector<1x4x256xf32> to vector<4x256xf32>
    %110 = arith.addf %107, %109 : vector<4x256xf32>
    %cst_108 = arith.constant 0.000000e+00 : f32
    %111 = vector.broadcast %cst_108 : f32 to vector<4x256xf32>
    %112 = arith.cmpf oge, %110, %111 : vector<4x256xf32>
    %cst_109 = arith.constant 1.000000e-01 : f32
    %113 = vector.broadcast %cst_109 : f32 to vector<4x256xf32>
    %114 = arith.mulf %113, %110 : vector<4x256xf32>
    %115 = arith.select %112, %110, %114 : vector<4x256xi1>, vector<4x256xf32>
    %c0_110 = arith.constant 0 : index
    %c0_111 = arith.constant 0 : index
    %c0_112 = arith.constant 0 : index
    %116 = vector.load %arg9[%c0_110, %c0_111, %c0_112] : memref<1x4x256xf32, #tpu.memory_space<vmem>>, vector<1x4x256xf32>
    %117 = vector.shape_cast %116 : vector<1x4x256xf32> to vector<4x256xf32>
    %118 = vector.shape_cast %115 : vector<4x256xf32> to vector<1x4x256xf32>
    tpu.vector_store %arg9[%c0_110, %c0_111, %c0_112], %118 {strides = array<i32>} : memref<1x4x256xf32, #tpu.memory_space<vmem>>, vector<1x4x256xf32>,
    return
  }
  func.func @transform_0(%arg0: i32) -> (i32, i32) {
    %c0_i32 = arith.constant 0 : i32
    %c0_i32_0 = arith.constant 0 : i32
    %c0_i32_1 = arith.constant 0 : i32
    return %c0_i32, %c0_i32_0 : i32, i32
  }
  func.func @transform_1(%arg0: i32) -> (i32, i32, i32) {
    %c0_i32 = arith.constant 0 : i32
    %c0_i32_0 = arith.constant 0 : i32
    %c0_i32_1 = arith.constant 0 : i32
    return %arg0, %c0_i32, %c0_i32_0 : i32, i32, i32
  }
  func.func @transform_2(%arg0: i32) -> (i32, i32) {
    %c0_i32 = arith.constant 0 : i32
    %c0_i32_0 = arith.constant 0 : i32
    %c0_i32_1 = arith.constant 0 : i32
    return %c0_i32, %c0_i32_0 : i32, i32
  }
  func.func @transform_3(%arg0: i32) -> (i32, i32) {
    %c0_i32 = arith.constant 0 : i32
    %c0_i32_0 = arith.constant 0 : i32
    %c0_i32_1 = arith.constant 0 : i32
    return %c0_i32, %c0_i32_0 : i32, i32
  }
  func.func @transform_4(%arg0: i32) -> (i32, i32) {
    %c0_i32 = arith.constant 0 : i32
    %c0_i32_0 = arith.constant 0 : i32
    %c0_i32_1 = arith.constant 0 : i32
    return %c0_i32, %c0_i32_0 : i32, i32
  }
  func.func @transform_5(%arg0: i32) -> (i32, i32) {
    %c0_i32 = arith.constant 0 : i32
    %c0_i32_0 = arith.constant 0 : i32
    %c0_i32_1 = arith.constant 0 : i32
    return %c0_i32, %c0_i32_0 : i32, i32
  }
  func.func @transform_6(%arg0: i32) -> (i32, i32) {
    %c0_i32 = arith.constant 0 : i32
    %c0_i32_0 = arith.constant 0 : i32
    %c0_i32_1 = arith.constant 0 : i32
    return %c0_i32, %c0_i32_0 : i32, i32
  }
  func.func @transform_7(%arg0: i32) -> (i32, i32) {
    %c0_i32 = arith.constant 0 : i32
    %c0_i32_0 = arith.constant 0 : i32
    %c0_i32_1 = arith.constant 0 : i32
    return %c0_i32, %c0_i32_0 : i32, i32
  }
  func.func @transform_8(%arg0: i32) -> (i32, i32, i32) {
    %c0_i32 = arith.constant 0 : i32
    %c0_i32_0 = arith.constant 0 : i32
    %c0_i32_1 = arith.constant 0 : i32
    return %arg0, %c0_i32, %c0_i32_0 : i32, i32, i32
  }
}

</mosaic_0001>

<bundles_post_ra>
// kernel: basic_block_forward.1
= control target key start
LH: loop header
LB: loop body
LE: loop exit
PB: predicated region body
PF: predicated region fallthrough
CT: control target
= control target key end

     0   :  { %s1142_s27 = smov 0   ;;  %s1365_s0 = inlined_call_operand.vmem [shape: bf16[3,256], index: 0, kind: input, shape index: {}]   ;;  %s1366_s1 = inlined_call_operand.vmem [shape: f32[2,4,256], index: 1, kind: input, shape index: {}]   ;;  %s1367_s2 = inlined_call_operand.vmem [shape: bf16[4,144], index: 2, kind: input, shape index: {}]   ;;  %s1368_s3 = inlined_call_operand.vmem [shape: f32[4,1], index: 3, kind: input, shape index: {}]   ;;  %s1369_s4 = inlined_call_operand.vmem [shape: bf16[4,144], index: 4, kind: input, shape index: {}]   ;;  %s1370_s5 = inlined_call_operand.vmem [shape: f32[4,1], index: 5, kind: input, shape index: {}]   ;;  %s1371_s6 = inlined_call_operand.vmem [shape: bf16[4,144], index: 6, kind: input, shape index: {}]   ;;  %s1372_s7 = inlined_call_operand.vmem [shape: f32[4,1], index: 7, kind: input, shape index: {}]   ;;  %s1373_s8 = inlined_call_operand.vmem [shape: f32[2,4,256], index: 8, kind: output, shape index: {}]  }
   0x1 LB: > { %s1039_s28 = sadd.s32 4294967295, %s1086_s27   ;;  %p1043_p0 = scmp.ge.s32.totalorder %s1086_s27, 1  ;;  %s1086_s27 = sphi %s1142_s27, %s18_s27  }
   0x2   : > { %p262_p1 = scmp.lt.s32.totalorder %s1086_s27, 3 }
   0x4   : > { %p263_p2 = pnand %p1043_p0, %p262_p1 }
   0x5   : > { %p296_p3 = scmp.lt.s32.totalorder (!%p263_p2), %s1039_s28, 1  ;;  %v1048_v0 = vld.sshfl [vmem:[%s1365_s0] sm:$0x11 pattern:$0x76325410] (!%p263_p2)  ;;  %v362_v1 = vlaneseq (!%p263_p2)  ;;  %vm311_vm0 = vcmask (!%p263_p2), 123904  }
   0x6   : > { %266 = sbr.rel (%p263_p2) target bundleno = 1175 (0x497), region = 52  ;;  %v359_v2 = vshrl.u32 (!%p263_p2), %v1048_v0, 16  ;;  %v357_v3 = vcombine.high (!%p263_p2), %v1048_v0, %v1048_v0  ;;  %v1049_v4 = vld.sshfl [vmem:[%s1365_s0] sm:$0x22 pattern:$0x76325410] (!%p263_p2) }
   0x7   : > { %v363_v5 = vshrl.u32 (!%p263_p2), %v362_v1, 7  ;;  %v384_v6 = vcombine.high (!%p263_p2), %v1049_v4, %v1049_v4  ;;  %v1088_v9 = vmov (!%p263_p2), 0   ;;  %vm307_vm1 = vcmask (!%p263_p2), 132096   ;;  %s1089_s15 = smov (!%p263_p2), 16   ;;  %s1090_s16 = smov (!%p263_p2), 17  }
   0x8   : > { %v360_v7 = vpack.i.b16 (!%p263_p2), %v359_v2, %v359_v2  ;;  %v367_v8 = vshrl.u32 (!%p263_p2), %v357_v3, 16  ;;  %309 = vst [vmem:[#allocation2 + $0x8] sm:$0xfc] (!%p263_p2), %v1088_v9  ;;  %310 = vst [vmem:[#allocation2 + $0x10] sm:$0xfc] (!%p263_p2), %v1088_v9  ;;  %1077 = vset.pattern.permute.xlu0 (!%p263_p2), %v1088_v9  ;;  %1078 = vset.pattern.permute.xlu1 (!%p263_p2), %v1088_v9  ;;  %vm315_vm2 = vcmask (!%p263_p2), 115712   ;;  %v386_v19 = vpack.i.b16 (!%p263_p2), %v1049_v4, %v1049_v4 }
   0x9   : > { %313 = vst [vmem:[#allocation2 + $0x28] sm:$0xfc] (!%p263_p2), %v1088_v9  ;;  %314 = vst [vmem:[#allocation2 + $0x30] sm:$0xfc] (!%p263_p2), %v1088_v9  ;;  %v364_v10 = vsub.s32 (!%p263_p2), 0, %v363_v5  ;;  %v390_v12 = vsub.s32 (!%p263_p2), 1, %v363_v5  ;;  %v393_v13 = vpack.i.b16 (!%p263_p2), %v384_v6, %v384_v6 }
   0xa   : > { %317 = vst [vmem:[#allocation2 + $0x48] sm:$0xfc] (!%p263_p2), %v1088_v9  ;;  %318 = vst [vmem:[#allocation2 + $0x50] sm:$0xfc] (!%p263_p2), %v1088_v9  ;;  %v368_v11 = vpack.i.b16 (!%p263_p2), %v367_v8, %v367_v8  ;;  %vm319_vm3 = vcmask (!%p263_p2), 1024   ;;  %s1091_s17 = smov (!%p263_p2), 15  }
   0xb   : > { %321 = vst [vmem:[#allocation2 + $0x68] sm:$0xfc] (!%p263_p2), %v1088_v9  ;;  %322 = vst [vmem:[#allocation2 + $0x70] sm:$0xfc] (!%p263_p2), %v1088_v9  ;;  %v1189_v15 = vrot.slane (!%p263_p2), %v360_v7, %v364_v10  ;;  %v1204_v22 = vrot.slane (!%p263_p2), %v393_v13, %v390_v12  ;;  %v1208_v24 = vrot.slane (!%p263_p2), %v386_v19, %v390_v12  ;;  %vm325_vm4 = vcmask (!%p263_p2), 1042424   ;;  %s1092_s18 = smov (!%p263_p2), 1  }
   0xc   : > { %323 = vst [vmem:[#allocation2 + $0x88] sm:$0xfc] (!%p263_p2), %v1088_v9  ;;  %324 = vst [vmem:[#allocation2 + $0x90] sm:$0xfc] (!%p263_p2), %v1088_v9  ;;  %v1197_v18 = vrot.slane (!%p263_p2), %v368_v11, %v364_v10  ;;  %vm329_vm5 = vcmask (!%p263_p2), 1042312   ;;  %s1093_s19 = smov (!%p263_p2), 127  }
   0xd   : > { %s1381_s28 = smov (!%p296_p3, %s1039_s28), 1  ;;  %327 = vst [vmem:[#allocation2 + $0xa8] sm:$0xfc] %v1088_v9  ;;  %328 = vst [vmem:[#allocation2 + $0xb0] sm:$0xfc] %v1088_v9  ;;  %vm333_vm6 = vcmask 1042304  }
   0xe   : > { %331 = vst [vmem:[#allocation2 + $0xc8] sm:$0xfc] %v1088_v9  ;;  %332 = vst [vmem:[#allocation2 + $0xd0] sm:$0xfc] %v1088_v9  ;;  %s1058_s11 = sshll.u32 %s1381_s28, 3  ;;  %s1094_s20 = smov 113  }
   0xf   : > { %335 = vst [vmem:[#allocation2 + $0xe8] sm:$0xfc] %v1088_v9  ;;  %336 = vst [vmem:[#allocation2 + $0xf0] sm:$0xfc] %v1088_v9  ;;  %s300_s14 = scalar_lea.vmem %s1366_s1, %s1058_s11  ;;  %vm337_vm7 = vcmask 1042296   ;;  %s1095_s21 = smov 112  }
  0x10   : > { %339 = vst [vmem:[#allocation2 + $0x108] sm:$0xfc] %v1088_v9  ;;  %340 = vst [vmem:[#allocation2 + $0x110] sm:$0xfc] %v1088_v9  ;;  %v1187_v14 = vld [vmem:[%s300_s14] sm:$0xff]  ;;  %s1096_s22 = smov 111  }
  0x11   : > { %312 = vst.msk [vmem:[#allocation2 + $0x28] sm:$0x3] %vm311_vm0, %v1088_v9  ;;  %v347_v16 = vpack.c.bf16 %v1187_v14, %v1187_v14  ;;  %v1195_v17 = vcombine.high %v1187_v14, %v1187_v14  ;;  %v1234_v27 = vld.sshfl [vmem:[%s1367_s2] sm:$0x33 pattern:$0x76325410] }
  0x12   : > { %308 = vst.msk [vmem:[#allocation2 + $0x8] sm:$0x3] %vm307_vm1, %v1088_v9  ;;  %v546_v28 = vcombine.high %v1234_v27, %v1234_v27  ;;  %vm422_vm8 = vcmask 130048   ;;  %v532_v29 = vld [vmem:[%s1368_s3] sm:$0xf]  ;;  %vm427_vm9 = vcmask 1041536  }
  0x13   : > { %316 = vst.msk [vmem:[#allocation2 + $0x48] sm:$0x3] %vm315_vm2, %v1088_v9  ;;  %418 = vrot.lane.b32.xlu1 %v347_v16, %s1089_s15  ;;  %459 = vst [vmem:[#allocation2 + $0x88] sm:$0x3] %v347_v16  ;;  %v374_v20 = vmul.bf16 %v1189_v15, %v347_v16  ;;  %v348_v21 = vpack.c.bf16 %v1195_v17, %v1195_v17  ;;  %v399_v26 = vmul.bf16 %v1208_v24, %v347_v16  ;;  %vm412_vm10 = vcmask 1041544  }
  0x14   : > { %320 = vst.msk [vmem:[#allocation2 + $0x68] sm:$0x3] %vm319_vm3, %v1088_v9  ;;  %1051 = vmatprep.mubr.msk.bf16.mxu0 %vm422_vm8, %v546_v28  ;;  %vm407_vm11 = vcmask 138240   ;;  %vm437_vm12 = vcmask 121856   ;;  %vm442_vm13 = vcmask 1041528   ;;  %vm450_vm14 = vcmask 7168  }
  0x15   : > { %403 = vrot.lane.b32.xlu0 %v374_v20, %s1090_s16  ;;  %460 = vst [vmem:[#allocation2 + $0x90] sm:$0x3] %v348_v21  ;;  %v375_v23 = vmul.bf16 %v1197_v18, %v348_v21  ;;  %v400_v25 = vmul.bf16 %v1204_v22, %v348_v21  ;;  %326 = vst.msk [vmem:[#allocation2 + $0xb0] sm:$0x3] %vm325_vm4, %v1088_v9  ;;  %vm455_vm15 = vcmask 1041416   ;;  %vm472_vm0 = vcmask 1033216  }
  0x16   : > { %330 = vst.msk [vmem:[#allocation2 + $0xd0] sm:$0x3] %vm329_vm5, %v1088_v9  ;;  %vm465_vm1 = vcmask 1039360   ;;  %vm485_vm2 = vcmask 918528   ;;  %vm478_vm3 = vcmask 924672   ;;  %vm498_vm4 = vcmask 910336  }
  0x17   : > { %420 = vrot.lane.b32.xlu1 %v348_v21, %s1089_s15  ;;  %334 = vst.msk [vmem:[#allocation2 + $0xf0] sm:$0x3] %vm333_vm6, %v1088_v9  ;;  %vm491_vm5 = vcmask 916480   ;;  %vm1374_vm6 = vcmask 902144  }
  0x18   : > { %338 = vst.msk [vmem:[#allocation2 + $0x110] sm:$0x3] %vm337_vm7, %v1088_v9  ;;  %vm1375_vm7 = vcmask 908288  }
  0x19   : > { %405 = vrot.lane.b32.xlu0 %v375_v23, %s1090_s16 }
  0x1a   : > { %v521_v61 = vld [vmem:[#allocation2 + $0x88] sm:$0xff] }
  0x1b   : > { %435 = vrot.lane.b32.xlu1 %v400_v25, %s1091_s17 }
  0x1c   : > { %v522_v57 = vld [vmem:[#allocation2 + $0x90] sm:$0xff] }
  0x1d   : > { %433 = vrot.lane.b32.xlu0 %v399_v26, %s1091_s17 }
  0x1f   : > { %448 = vrot.lane.b32.xlu1 %v375_v23, %s1092_s18 }
  0x21   : > { %446 = vrot.lane.b32.xlu0 %v374_v20, %s1092_s18 }
  0x23   : > { %463 = vrot.lane.b32.xlu1 %v400_v25, %s1093_s19 }
  0x25   : > { %461 = vrot.lane.b32.xlu0 %v399_v26, %s1093_s19 }
  0x27   : > { %476 = vrot.lane.b32.xlu1 %v375_v23, %s1094_s20 }
  0x29   : > { %474 = vrot.lane.b32.xlu0 %v374_v20, %s1094_s20 }
  0x2b   : > { %489 = vrot.lane.b32.xlu1 %v348_v21, %s1095_s21 }
  0x2d   : > { %487 = vrot.lane.b32.xlu0 %v347_v16, %s1095_s21 }
  0x2f   : > { %502 = vrot.lane.b32.xlu1 %v400_v25, %s1096_s22 }
  0x31   : > { %500 = vrot.lane.b32.xlu0 %v399_v26, %s1096_s22 }
  0x35   : > { %535 = vperm.xlu0 %1077, %v532_v29  }
  0x85   : > { %v419_v30 = vpop.permute.xlu1 %418 }
  0x86   : > { %428 = vst.msk [vmem:[#allocation2 + $0x28] sm:$0x3] %vm427_vm9, %v419_v30 }
  0x87   : > { %v404_v31 = vpop.permute.xlu0 %403 }
  0x88   : > { %413 = vst.msk [vmem:[#allocation2 + $0x8] sm:$0x3] %vm412_vm10, %v404_v31 }
  0x89   : > { %v421_v32 = vpop.permute.xlu1 %420 }
  0x8a   : > { %v423_v33 = vsel %vm422_vm8, %v419_v30, %v421_v32  ;;  %v1285_v32 = vld.sshfl [vmem:[%s1369_s4] sm:$0x33 pattern:$0x76325410] }
  0x8b   : > { %429 = vst [vmem:[#allocation2 + $0x30] sm:$0x3] %v423_v33  ;;  %v406_v34 = vpop.permute.xlu0 %405  ;;  %v734_v33 = vcombine.high %v1285_v32, %v1285_v32 }
  0x8c   : > { %v408_v35 = vsel %vm407_vm11, %v404_v31, %v406_v34  ;;  %v720_v31 = vld [vmem:[%s1370_s5] sm:$0xf] }
  0x8d   : > { %414 = vst [vmem:[#allocation2 + $0x10] sm:$0x3] %v408_v35  ;;  %v436_v36 = vpop.permute.xlu1 %435  ;;  %v515_v49 = vld [vmem:[#allocation2 + $0x28] sm:$0xff]  ;;  %1053 = vmatprep.mubr.msk.bf16.mxu1 %vm422_vm8, %v734_v33 }
  0x8f   : > { %v434_v37 = vpop.permute.xlu0 %433  ;;  %v513_v43 = vld [vmem:[#allocation2 + $0x8] sm:$0xff] }
  0x90   : > { %v438_v38 = vsel %vm437_vm12, %v434_v37, %v436_v36  ;;  %443 = vst.msk [vmem:[#allocation2 + $0x48] sm:$0x3] %vm442_vm13, %v434_v37 }
  0x91   : > { %444 = vst [vmem:[#allocation2 + $0x50] sm:$0x3] %v438_v38  ;;  %v449_v39 = vpop.permute.xlu1 %448 }
  0x92   : > { %v516_v45 = vld [vmem:[#allocation2 + $0x30] sm:$0xff] }
  0x93   : > { %v447_v40 = vpop.permute.xlu0 %446 }
  0x94   : > { %v514_v41 = vld [vmem:[#allocation2 + $0x10] sm:$0xff]  ;;  %v451_v42 = vsel %vm450_vm14, %v447_v40, %v449_v39  ;;  %456 = vst.msk [vmem:[#allocation2 + $0x68] sm:$0x3] %vm455_vm15, %v447_v40 }
  0x95   : > { %552 = vmatprep.subr.bf16.mxu0 %v514_v41  ;;  %457 = vst [vmem:[#allocation2 + $0x70] sm:$0x3] %v451_v42  ;;  %v464_v44 = vpop.permute.xlu1 %463 }
  0x96   : > { %553 = vmatpush1.bf16.msra.mxu0 %v513_v43  ;;  %473 = vst.msk [vmem:[#allocation2 + $0xb0] sm:$0x3] %vm472_vm0, %v464_v44 }
  0x97   : > { %554 = vmatprep.subr.bf16.mxu0 %v516_v45  ;;  %v462_v46 = vpop.permute.xlu0 %461  ;;  %v517_v54 = vld [vmem:[#allocation2 + $0x48] sm:$0xff] }
  0x98   : > { %v518_v47 = vld [vmem:[#allocation2 + $0x50] sm:$0xff]  ;;  %v466_v48 = vsel %vm465_vm1, %v462_v46, %v464_v44 }
  0x99   : > { %471 = vst [vmem:[#allocation2 + $0xa8] sm:$0x3] %v466_v48  ;;  %v477_v50 = vpop.permute.xlu1 %476 }
  0x9a   : > { %555 = vmatpush1.bf16.msra.mxu0 %v515_v49  ;;  %486 = vst.msk [vmem:[#allocation2 + $0xd0] sm:$0x3] %vm485_vm2, %v477_v50 }
  0x9b   : > { %556 = vmatprep.subr.bf16.mxu0 %v518_v47  ;;  %v475_v51 = vpop.permute.xlu0 %474  ;;  %v519_v59 = vld [vmem:[#allocation2 + $0x68] sm:$0xff] }
  0x9c   : > { %v520_v52 = vld [vmem:[#allocation2 + $0x70] sm:$0xff]  ;;  %v479_v53 = vsel %vm478_vm3, %v475_v51, %v477_v50 }
  0x9d   : > { %484 = vst [vmem:[#allocation2 + $0xc8] sm:$0x3] %v479_v53  ;;  %v490_v55 = vpop.permute.xlu1 %489  ;;  %v524_v63 = vld [vmem:[#allocation2 + $0xb0] sm:$0xff] }
  0x9e   : > { %557 = vmatpush1.bf16.msra.mxu0 %v517_v54  ;;  %499 = vst.msk [vmem:[#allocation2 + $0xf0] sm:$0x3] %vm498_vm4, %v490_v55 }
  0x9f   : > { %558 = vmatprep.subr.bf16.mxu0 %v520_v52  ;;  %v488_v56 = vpop.permute.xlu0 %487 }
  0xa0   : > { %v492_v58 = vsel %vm491_vm5, %v488_v56, %v490_v55  ;;  %v523_v1 = vld [vmem:[#allocation2 + $0xa8] sm:$0xff] }
  0xa1   : > { %497 = vst [vmem:[#allocation2 + $0xe8] sm:$0x3] %v492_v58  ;;  %v503_v60 = vpop.permute.xlu1 %502  ;;  %v526_v2 = vld [vmem:[#allocation2 + $0xd0] sm:$0xff] }
  0xa2   : > { %559 = vmatpush1.bf16.msra.mxu0 %v519_v59  ;;  %512 = vst.msk [vmem:[#allocation2 + $0x110] sm:$0x3] %vm1374_vm6, %v503_v60 }
  0xa3   : > { %560 = vmatprep.subr.bf16.mxu0 %v522_v57  ;;  %v501_v62 = vpop.permute.xlu0 %500 }
  0xa4   : > { %v505_v0 = vsel %vm1375_vm7, %v501_v62, %v503_v60  ;;  %v525_v3 = vld [vmem:[#allocation2 + $0xc8] sm:$0xff] }
  0xa5   : > { %510 = vst [vmem:[#allocation2 + $0x108] sm:$0x3] %v505_v0  ;;  %v528_v4 = vld [vmem:[#allocation2 + $0xf0] sm:$0xff] }
  0xa6   : > { %561 = vmatpush1.bf16.msra.mxu0 %v521_v61 }
  0xa7   : > { %562 = vmatprep.subr.bf16.mxu0 %v524_v63 }
  0xa8   : > { %v527_v5 = vld [vmem:[#allocation2 + $0xe8] sm:$0xff] }
  0xa9   : > { %v530_v6 = vld [vmem:[#allocation2 + $0x110] sm:$0xff] }
  0xaa   : > { %563 = vmatpush1.bf16.msra.mxu0 %v523_v1 }
  0xab   : > { %564 = vmatprep.subr.bf16.mxu0 %v526_v2 }
  0xac   : > { %v529_v7 = vld [vmem:[#allocation2 + $0x108] sm:$0xff] }
  0xae   : > { %565 = vmatpush1.bf16.msra.mxu0 %v525_v3 }
  0xaf   : > { %566 = vmatprep.subr.bf16.mxu0 %v528_v4 }
  0xb2   : > { %567 = vmatpush1.bf16.msra.mxu0 %v527_v5 }
  0xb3   : > { %568 = vmatprep.subr.bf16.mxu0 %v530_v6 }
  0xb4   : > { %v536_v8 = vpop.permute.xlu0 %535 }
  0xb6   : > { %569 = vmatpush1.bf16.msra.mxu0 %v529_v7 }
  0xb9   : > { %585 = vmatmul.mubr.bf16.vlgmr.msra.gmra.mrb[0].mxu0 %v1234_v27 }
 0x18c   : > { %v586_v9 = vpop.f32.mrb[0].mxu0 }
 0x18d   : > { %v587_v10 = vadd.f32 %v586_v9, %v536_v8  ;;  %v588_v11 = vpop.f32.mrb[1].mxu0 }
 0x18e   : > { %v589_v12 = vadd.f32 %v588_v11, %v536_v8  ;;  %v590_v13 = vpop.f32.mrb[2].mxu0 }
 0x18f   : > { %vm593_vm6 = vcmp.ge.f32.partialorder %v587_v10, 0.0  ;;  %v595_v16 = vmul.f32 0.1, %v587_v10  ;;  %v591_v19 = vpop.f32.mrb[3].mxu0 }
 0x190   : > { %vm594_vm7 = vcmp.ge.f32.partialorder %v589_v12, 0.0  ;;  %v596_v20 = vmul.f32 0.1, %v589_v12 }
 0x191   : > { %v597_v21 = vsel %vm593_vm6, %v587_v10, %v595_v16  ;;  %vm1376_vm6 = vcmask 908288  }
 0x192   : > { %v599_v23 = vpack.c.bf16 %v597_v21, %v597_v21  ;;  %v598_v25 = vsel %vm594_vm7, %v589_v12, %v596_v20  ;;  %vm1377_vm7 = vcmask 902144  }
 0x193   : > { %v600_v26 = vpack.c.bf16 %v598_v25, %v598_v25 }
 0x194   : > { %655 = vst [vmem:[#allocation2 + $0x88] sm:$0x3] %v599_v23  ;;  %620 = vrot.lane.b32.xlu0 %v599_v23, %s1089_s15  ;;  %v601_v27 = vmul.bf16 %v599_v23, %v1189_v15  ;;  %v603_v28 = vmul.bf16 %v599_v23, %v1208_v24 }
 0x195   : > { %656 = vst [vmem:[#allocation2 + $0x90] sm:$0x3] %v600_v26  ;;  %v602_v29 = vmul.bf16 %v600_v26, %v1197_v18  ;;  %v604_v30 = vmul.bf16 %v600_v26, %v1204_v22 }
 0x196   : > { %607 = vrot.lane.b32.xlu1 %v601_v27, %s1090_s16 }
 0x198   : > { %633 = vrot.lane.b32.xlu0 %v603_v28, %s1091_s17 }
 0x19a   : > { %609 = vrot.lane.b32.xlu1 %v602_v29, %s1090_s16 }
 0x19b   : > { %v709_v1 = vld [vmem:[#allocation2 + $0x88] sm:$0xff] }
 0x19c   : > { %644 = vrot.lane.b32.xlu0 %v601_v27, %s1092_s18  ;;  %v710_v62 = vld [vmem:[#allocation2 + $0x90] sm:$0xff] }
 0x19e   : > { %622 = vrot.lane.b32.xlu1 %v600_v26, %s1089_s15 }
 0x1a0   : > { %657 = vrot.lane.b32.xlu0 %v603_v28, %s1093_s19 }
 0x1a2   : > { %635 = vrot.lane.b32.xlu1 %v604_v30, %s1091_s17 }
 0x1a4   : > { %668 = vrot.lane.b32.xlu0 %v601_v27, %s1094_s20 }
 0x1a6   : > { %646 = vrot.lane.b32.xlu1 %v602_v29, %s1092_s18 }
 0x1a8   : > { %679 = vrot.lane.b32.xlu0 %v599_v23, %s1095_s21 }
 0x1aa   : > { %659 = vrot.lane.b32.xlu1 %v604_v30, %s1093_s19 }
 0x1ac   : > { %690 = vrot.lane.b32.xlu0 %v603_v28, %s1096_s22 }
 0x1ae   : > { %670 = vrot.lane.b32.xlu1 %v602_v29, %s1094_s20 }
 0x1b0   : > { %723 = vperm.xlu0 %1077, %v720_v31  }
 0x1b2   : > { %681 = vrot.lane.b32.xlu1 %v600_v26, %s1095_s21 }
 0x1b6   : > { %692 = vrot.lane.b32.xlu1 %v604_v30, %s1096_s22 }
 0x206   : > { %v621_v34 = vpop.permute.xlu0 %620 }
 0x207   : > { %628 = vst.msk [vmem:[#allocation2 + $0x28] sm:$0x3] %vm427_vm9, %v621_v34 }
 0x208   : > { %v608_v35 = vpop.permute.xlu1 %607 }
 0x209   : > { %615 = vst.msk [vmem:[#allocation2 + $0x8] sm:$0x3] %vm412_vm10, %v608_v35 }
 0x20a   : > { %v634_v36 = vpop.permute.xlu0 %633 }
 0x20b   : > { %641 = vst.msk [vmem:[#allocation2 + $0x48] sm:$0x3] %vm442_vm13, %v634_v36 }
 0x20c   : > { %v610_v37 = vpop.permute.xlu1 %609 }
 0x20d   : > { %v611_v38 = vsel %vm407_vm11, %v608_v35, %v610_v37 }
 0x20e   : > { %616 = vst [vmem:[#allocation2 + $0x10] sm:$0x3] %v611_v38  ;;  %v645_v39 = vpop.permute.xlu0 %644  ;;  %v703_v52 = vld [vmem:[#allocation2 + $0x28] sm:$0xff] }
 0x20f   : > { %652 = vst.msk [vmem:[#allocation2 + $0x68] sm:$0x3] %vm455_vm15, %v645_v39 }
 0x210   : > { %v623_v40 = vpop.permute.xlu1 %622  ;;  %v701_v47 = vld [vmem:[#allocation2 + $0x8] sm:$0xff] }
 0x211   : > { %v624_v41 = vsel %vm422_vm8, %v621_v34, %v623_v40 }
 0x212   : > { %629 = vst [vmem:[#allocation2 + $0x30] sm:$0x3] %v624_v41  ;;  %v658_v42 = vpop.permute.xlu0 %657  ;;  %v705_v57 = vld [vmem:[#allocation2 + $0x48] sm:$0xff] }
 0x214   : > { %v636_v43 = vpop.permute.xlu1 %635 }
 0x215   : > { %v637_v44 = vsel %vm437_vm12, %v634_v36, %v636_v43  ;;  %v702_v45 = vld [vmem:[#allocation2 + $0x10] sm:$0xff] }
 0x216   : > { %642 = vst [vmem:[#allocation2 + $0x50] sm:$0x3] %v637_v44  ;;  %v669_v46 = vpop.permute.xlu0 %668  ;;  %739 = vmatprep.subr.bf16.mxu1 %v702_v45  ;;  %v707_v61 = vld [vmem:[#allocation2 + $0x68] sm:$0xff] }
 0x217   : > { %740 = vmatpush1.bf16.msra.mxu1 %v701_v47 }
 0x218   : > { %v647_v48 = vpop.permute.xlu1 %646 }
 0x219   : > { %v648_v49 = vsel %vm450_vm14, %v645_v39, %v647_v48  ;;  %v704_v50 = vld [vmem:[#allocation2 + $0x30] sm:$0xff] }
 0x21a   : > { %653 = vst [vmem:[#allocation2 + $0x70] sm:$0x3] %v648_v49  ;;  %v680_v51 = vpop.permute.xlu0 %679  ;;  %741 = vmatprep.subr.bf16.mxu1 %v704_v50 }
 0x21b   : > { %742 = vmatpush1.bf16.msra.mxu1 %v703_v52 }
 0x21c   : > { %v660_v53 = vpop.permute.xlu1 %659 }
 0x21d   : > { %v661_v54 = vsel %vm465_vm1, %v658_v42, %v660_v53  ;;  %667 = vst.msk [vmem:[#allocation2 + $0xb0] sm:$0x3] %vm472_vm0, %v660_v53  ;;  %v706_v55 = vld [vmem:[#allocation2 + $0x50] sm:$0xff] }
 0x21e   : > { %666 = vst [vmem:[#allocation2 + $0xa8] sm:$0x3] %v661_v54  ;;  %v691_v56 = vpop.permute.xlu0 %690  ;;  %743 = vmatprep.subr.bf16.mxu1 %v706_v55 }
 0x21f   : > { %744 = vmatpush1.bf16.msra.mxu1 %v705_v57 }
 0x220   : > { %v671_v58 = vpop.permute.xlu1 %670 }
 0x221   : > { %v672_v59 = vsel %vm478_vm3, %v669_v46, %v671_v58  ;;  %678 = vst.msk [vmem:[#allocation2 + $0xd0] sm:$0x3] %vm485_vm2, %v671_v58  ;;  %v708_v60 = vld [vmem:[#allocation2 + $0x70] sm:$0xff] }
 0x222   : > { %677 = vst [vmem:[#allocation2 + $0xc8] sm:$0x3] %v672_v59  ;;  %745 = vmatprep.subr.bf16.mxu1 %v708_v60 }
 0x223   : > { %746 = vmatpush1.bf16.msra.mxu1 %v707_v61 }
 0x224   : > { %747 = vmatprep.subr.bf16.mxu1 %v710_v62  ;;  %v682_v63 = vpop.permute.xlu1 %681  ;;  %v712_v2 = vld [vmem:[#allocation2 + $0xb0] sm:$0xff] }
 0x225   : > { %v683_v0 = vsel %vm491_vm5, %v680_v51, %v682_v63  ;;  %689 = vst.msk [vmem:[#allocation2 + $0xf0] sm:$0x3] %vm498_vm4, %v682_v63  ;;  %v711_v5 = vld [vmem:[#allocation2 + $0xa8] sm:$0xff] }
 0x226   : > { %688 = vst [vmem:[#allocation2 + $0xe8] sm:$0x3] %v683_v0 }
 0x227   : > { %748 = vmatpush1.bf16.msra.mxu1 %v709_v1 }
 0x228   : > { %749 = vmatprep.subr.bf16.mxu1 %v712_v2  ;;  %v693_v3 = vpop.permute.xlu1 %692  ;;  %v714_v6 = vld [vmem:[#allocation2 + $0xd0] sm:$0xff] }
 0x229   : > { %v694_v4 = vsel %vm1376_vm6, %v691_v56, %v693_v3  ;;  %700 = vst.msk [vmem:[#allocation2 + $0x110] sm:$0x3] %vm1377_vm7, %v693_v3  ;;  %v713_v7 = vld [vmem:[#allocation2 + $0xc8] sm:$0xff] }
 0x22a   : > { %699 = vst [vmem:[#allocation2 + $0x108] sm:$0x3] %v694_v4 }
 0x22b   : > { %750 = vmatpush1.bf16.msra.mxu1 %v711_v5 }
 0x22c   : > { %751 = vmatprep.subr.bf16.mxu1 %v714_v6  ;;  %v716_v8 = vld [vmem:[#allocation2 + $0xf0] sm:$0xff] }
 0x22d   : > { %v715_v9 = vld [vmem:[#allocation2 + $0xe8] sm:$0xff] }
 0x22f   : > { %752 = vmatpush1.bf16.msra.mxu1 %v713_v7  ;;  %v724_v12 = vpop.permute.xlu0 %723 }
 0x230   : > { %753 = vmatprep.subr.bf16.mxu1 %v716_v8  ;;  %v718_v10 = vld [vmem:[#allocation2 + $0x110] sm:$0xff] }
 0x231   : > { %v717_v11 = vld [vmem:[#allocation2 + $0x108] sm:$0xff] }
 0x233   : > { %754 = vmatpush1.bf16.msra.mxu1 %v715_v9 }
 0x234   : > { %755 = vmatprep.subr.bf16.mxu1 %v718_v10 }
 0x237   : > { %756 = vmatpush1.bf16.msra.mxu1 %v717_v11 }
 0x23a   : > { %772 = vmatmul.mubr.bf16.vlgmr.msra.gmra.mrb[0].mxu1 %v1285_v32 }
 0x30d   : > { %v773_v13 = vpop.f32.mrb[0].mxu1 }
 0x30e   : > { %v774_v16 = vadd.f32 %v773_v13, %v724_v12  ;;  %v775_v19 = vpop.f32.mrb[1].mxu1 }
 0x30f   : > { %v776_v20 = vadd.f32 %v775_v19, %v724_v12  ;;  %v777_v21 = vpop.f32.mrb[2].mxu1 }
 0x310   : > { %vm780_vm6 = vcmp.ge.f32.partialorder %v774_v16, 0.0  ;;  %v782_v23 = vmul.f32 0.1, %v774_v16  ;;  %v778_v25 = vpop.f32.mrb[3].mxu1 }
 0x311   : > { %vm781_vm7 = vcmp.ge.f32.partialorder %v776_v20, 0.0  ;;  %v783_v26 = vmul.f32 0.1, %v776_v20 }
 0x312   : > { %v784_v27 = vsel %vm780_vm6, %v774_v16, %v782_v23 }
 0x313   : > { %v786_v28 = vpack.c.bf16 %v784_v27, %v784_v27  ;;  %v785_v29 = vsel %vm781_vm7, %v776_v20, %v783_v26 }
 0x314   : > { %v787_v30 = vpack.c.bf16 %v785_v29, %v785_v29 }
 0x315   : > { %842 = vst [vmem:[#allocation2 + $0x88] sm:$0x3] %v786_v28  ;;  %v788_v31 = vmul.bf16 %v786_v28, %v1189_v15  ;;  %v790_v33 = vmul.bf16 %v786_v28, %v1208_v24  ;;  %v1330_v15 = vld.sshfl [vmem:[%s1371_s6] sm:$0x33 pattern:$0x76325410] }
 0x316   : > { %843 = vst [vmem:[#allocation2 + $0x90] sm:$0x3] %v787_v30  ;;  %v789_v32 = vmul.bf16 %v787_v30, %v1197_v18  ;;  %v791_v34 = vmul.bf16 %v787_v30, %v1204_v22  ;;  %v921_v18 = vcombine.high %v1330_v15, %v1330_v15  ;;  %v907_v22 = vld [vmem:[%s1372_s7] sm:$0xf] }
 0x317   : > { %794 = vrot.lane.b32.xlu1 %v788_v31, %s1090_s16 }
 0x318   : > { %796 = vrot.lane.b32.xlu0 %v789_v32, %s1090_s16  ;;  %1055 = vmatprep.mubr.msk.bf16.mxu0 %vm422_vm8, %v921_v18 }
 0x31b   : > { %807 = vrot.lane.b32.xlu1 %v786_v28, %s1089_s15 }
 0x31c   : > { %809 = vrot.lane.b32.xlu0 %v787_v30, %s1089_s15  ;;  %v896_v0 = vld [vmem:[#allocation2 + $0x88] sm:$0xff] }
 0x31d   : > { %v897_v61 = vld [vmem:[#allocation2 + $0x90] sm:$0xff] }
 0x31f   : > { %820 = vrot.lane.b32.xlu1 %v790_v33, %s1091_s17 }
 0x320   : > { %822 = vrot.lane.b32.xlu0 %v791_v34, %s1091_s17 }
 0x323   : > { %831 = vrot.lane.b32.xlu1 %v788_v31, %s1092_s18 }
 0x324   : > { %833 = vrot.lane.b32.xlu0 %v789_v32, %s1092_s18  ;;  %s305_s18 = scalar_lea.vmem %s1373_s8, %s1058_s11 }
 0x327   : > { %844 = vrot.lane.b32.xlu1 %v790_v33, %s1093_s19 }
 0x328   : > { %846 = vrot.lane.b32.xlu0 %v791_v34, %s1093_s19 }
 0x32b   : > { %855 = vrot.lane.b32.xlu1 %v788_v31, %s1094_s20 }
 0x32c   : > { %857 = vrot.lane.b32.xlu0 %v789_v32, %s1094_s20 }
 0x32f   : > { %866 = vrot.lane.b32.xlu1 %v786_v28, %s1095_s21 }
 0x330   : > { %868 = vrot.lane.b32.xlu0 %v787_v30, %s1095_s21 }
 0x333   : > { %877 = vrot.lane.b32.xlu1 %v790_v33, %s1096_s22 }
 0x334   : > { %879 = vrot.lane.b32.xlu0 %v791_v34, %s1096_s22 }
 0x337   : > { %910 = vperm.xlu1 %1078, %v907_v22  }
 0x389   : > { %v795_v24 = vpop.permute.xlu1 %794 }
 0x38a   : > { %802 = vst.msk [vmem:[#allocation2 + $0x8] sm:$0x3] %vm412_vm10, %v795_v24  ;;  %v797_v35 = vpop.permute.xlu0 %796 }
 0x38b   : > { %v798_v36 = vsel %vm407_vm11, %v795_v24, %v797_v35 }
 0x38c   : > { %803 = vst [vmem:[#allocation2 + $0x10] sm:$0x3] %v798_v36 }
 0x38d   : > { %v808_v37 = vpop.permute.xlu1 %807 }
 0x38e   : > { %815 = vst.msk [vmem:[#allocation2 + $0x28] sm:$0x3] %vm427_vm9, %v808_v37  ;;  %v810_v38 = vpop.permute.xlu0 %809  ;;  %vm1379_vm9 = vcmask 902144  }
 0x38f   : > { %v811_v39 = vsel %vm422_vm8, %v808_v37, %v810_v38  ;;  %vm1378_vm8 = vcmask 908288  }
 0x390   : > { %816 = vst [vmem:[#allocation2 + $0x30] sm:$0x3] %v811_v39 }
 0x391   : > { %v821_v40 = vpop.permute.xlu1 %820  ;;  %v888_v44 = vld [vmem:[#allocation2 + $0x8] sm:$0xff] }
 0x392   : > { %828 = vst.msk [vmem:[#allocation2 + $0x48] sm:$0x3] %vm442_vm13, %v821_v40  ;;  %v823_v41 = vpop.permute.xlu0 %822 }
 0x393   : > { %v824_v42 = vsel %vm437_vm12, %v821_v40, %v823_v41  ;;  %v889_v43 = vld [vmem:[#allocation2 + $0x10] sm:$0xff] }
 0x394   : > { %829 = vst [vmem:[#allocation2 + $0x50] sm:$0x3] %v824_v42  ;;  %926 = vmatprep.subr.bf16.mxu0 %v889_v43 }
 0x395   : > { %927 = vmatpush1.bf16.msra.mxu0 %v888_v44  ;;  %v832_v45 = vpop.permute.xlu1 %831  ;;  %v890_v49 = vld [vmem:[#allocation2 + $0x28] sm:$0xff] }
 0x396   : > { %839 = vst.msk [vmem:[#allocation2 + $0x68] sm:$0x3] %vm455_vm15, %v832_v45  ;;  %v834_v46 = vpop.permute.xlu0 %833 }
 0x397   : > { %v835_v47 = vsel %vm450_vm14, %v832_v45, %v834_v46  ;;  %v891_v48 = vld [vmem:[#allocation2 + $0x30] sm:$0xff] }
 0x398   : > { %840 = vst [vmem:[#allocation2 + $0x70] sm:$0x3] %v835_v47  ;;  %928 = vmatprep.subr.bf16.mxu0 %v891_v48 }
 0x399   : > { %929 = vmatpush1.bf16.msra.mxu0 %v890_v49  ;;  %v845_v50 = vpop.permute.xlu1 %844  ;;  %v892_v54 = vld [vmem:[#allocation2 + $0x48] sm:$0xff] }
 0x39a   : > { %v847_v51 = vpop.permute.xlu0 %846 }
 0x39b   : > { %v848_v52 = vsel %vm465_vm1, %v845_v50, %v847_v51  ;;  %854 = vst.msk [vmem:[#allocation2 + $0xb0] sm:$0x3] %vm472_vm0, %v847_v51  ;;  %v893_v53 = vld [vmem:[#allocation2 + $0x50] sm:$0xff] }
 0x39c   : > { %853 = vst [vmem:[#allocation2 + $0xa8] sm:$0x3] %v848_v52  ;;  %930 = vmatprep.subr.bf16.mxu0 %v893_v53 }
 0x39d   : > { %931 = vmatpush1.bf16.msra.mxu0 %v892_v54  ;;  %v856_v55 = vpop.permute.xlu1 %855  ;;  %v894_v59 = vld [vmem:[#allocation2 + $0x68] sm:$0xff] }
 0x39e   : > { %v858_v56 = vpop.permute.xlu0 %857 }
 0x39f   : > { %v859_v57 = vsel %vm478_vm3, %v856_v55, %v858_v56  ;;  %865 = vst.msk [vmem:[#allocation2 + $0xd0] sm:$0x3] %vm485_vm2, %v858_v56  ;;  %v895_v58 = vld [vmem:[#allocation2 + $0x70] sm:$0xff] }
 0x3a0   : > { %864 = vst [vmem:[#allocation2 + $0xc8] sm:$0x3] %v859_v57  ;;  %932 = vmatprep.subr.bf16.mxu0 %v895_v58 }
 0x3a1   : > { %933 = vmatpush1.bf16.msra.mxu0 %v894_v59  ;;  %v867_v60 = vpop.permute.xlu1 %866 }
 0x3a2   : > { %v869_v62 = vpop.permute.xlu0 %868  ;;  %934 = vmatprep.subr.bf16.mxu0 %v897_v61  ;;  %v899_v2 = vld [vmem:[#allocation2 + $0xb0] sm:$0xff] }
 0x3a3   : > { %v870_v63 = vsel %vm491_vm5, %v867_v60, %v869_v62  ;;  %876 = vst.msk [vmem:[#allocation2 + $0xf0] sm:$0x3] %vm498_vm4, %v869_v62  ;;  %v898_v5 = vld [vmem:[#allocation2 + $0xa8] sm:$0xff] }
 0x3a4   : > { %875 = vst [vmem:[#allocation2 + $0xe8] sm:$0x3] %v870_v63 }
 0x3a5   : > { %935 = vmatpush1.bf16.msra.mxu0 %v896_v0  ;;  %v878_v1 = vpop.permute.xlu1 %877 }
 0x3a6   : > { %v880_v3 = vpop.permute.xlu0 %879  ;;  %936 = vmatprep.subr.bf16.mxu0 %v899_v2  ;;  %v901_v6 = vld [vmem:[#allocation2 + $0xd0] sm:$0xff] }
 0x3a7   : > { %v881_v4 = vsel %vm1378_vm8, %v878_v1, %v880_v3  ;;  %887 = vst.msk [vmem:[#allocation2 + $0x110] sm:$0x3] %vm1379_vm9, %v880_v3  ;;  %v900_v7 = vld [vmem:[#allocation2 + $0xc8] sm:$0xff] }
 0x3a8   : > { %886 = vst [vmem:[#allocation2 + $0x108] sm:$0x3] %v881_v4 }
 0x3a9   : > { %937 = vmatpush1.bf16.msra.mxu0 %v898_v5 }
 0x3aa   : > { %938 = vmatprep.subr.bf16.mxu0 %v901_v6  ;;  %v903_v8 = vld [vmem:[#allocation2 + $0xf0] sm:$0xff] }
 0x3ab   : > { %v902_v9 = vld [vmem:[#allocation2 + $0xe8] sm:$0xff] }
 0x3ad   : > { %939 = vmatpush1.bf16.msra.mxu0 %v900_v7 }
 0x3ae   : > { %940 = vmatprep.subr.bf16.mxu0 %v903_v8  ;;  %v905_v10 = vld [vmem:[#allocation2 + $0x110] sm:$0xff] }
 0x3af   : > { %v904_v11 = vld [vmem:[#allocation2 + $0x108] sm:$0xff] }
 0x3b1   : > { %941 = vmatpush1.bf16.msra.mxu0 %v902_v9 }
 0x3b2   : > { %942 = vmatprep.subr.bf16.mxu0 %v905_v10 }
 0x3b5   : > { %943 = vmatpush1.bf16.msra.mxu0 %v904_v11 }
 0x3b6   : > { %v911_v12 = vpop.permute.xlu1 %910 }
 0x3b8   : > { %959 = vmatmul.mubr.bf16.vlgmr.msra.gmra.mrb[4].mxu0 %v1330_v15 }
 0x48b   : > { %v960_v13 = vpop.f32.mrb[4].mxu0 }
 0x48c   : > { %v961_v16 = vadd.f32 %v960_v13, %v911_v12  ;;  %v962_v19 = vpop.f32.mrb[5].mxu0 }
 0x48d   : > { %v963_v20 = vadd.f32 %v962_v19, %v911_v12  ;;  %v964_v21 = vpop.f32.mrb[6].mxu0 }
 0x48e   : > { %v971_v23 = vadd.f32 %v961_v16, %v1187_v14  ;;  %v965_v25 = vpop.f32.mrb[7].mxu0 }
 0x48f   : > { %v972_v26 = vadd.f32 %v963_v20, %v1195_v17 }
 0x490   : > { %vm973_vm10 = vcmp.ge.f32.partialorder %v971_v23, 0.0  ;;  %v975_v27 = vmul.f32 0.1, %v971_v23 }
 0x491   : > { %vm974_vm11 = vcmp.ge.f32.partialorder %v972_v26, 0.0  ;;  %v976_v28 = vmul.f32 0.1, %v972_v26 }
 0x492   : > { %v977_v29 = vsel %vm973_vm10, %v971_v23, %v975_v27 }
 0x493   : > { %v978_v30 = vsel %vm974_vm11, %v972_v26, %v976_v28 }
 0x494   : > { %v981_v31 = vcombine.low %v977_v29, %v978_v30 }
 0x496   : > { %983 = vst [vmem:[%s305_s18] sm:$0xff] %v981_v31 }
 0x497 PF: > { %s18_s27 = sadd.s32 1, %s1086_s27  }
 0x498   : > { %p15_p4 = scmp.ge.s32.totalorder %s18_s27, 4  }
 0x49a   :  { %17 = sbr.rel (!%p15_p4) target bundleno = 1 (0x1), region = 82 }

</bundles_post_ra>
